<compile_context>
chip_gen: v5e
topology: v5e:2x2
jax: 0.10.0
libtpu: 0.0.40
codegen_flags: <defaults>
</compile_context>

<pallas_src>
import functools
from typing import List

import jax
import jax.numpy as jnp
from jax.experimental import pallas as pl
from jax.experimental.pallas import tpu as pltpu


def _round_up(x: int, m: int) -> int:
    return ((x + m - 1) // m) * m


def _mlp_kernel(num_hidden, compute_dtype, x_ref, *refs):
    """Fused MLP forward for one (batch-tile, K-tile) grid cell.

    refs = (w0, b0, w1, b1, ..., w_{nh-1}, b_{nh-1}, w_last_row, b_last,
            out_ref, acc_ref)
    Layer 0 is K-tiled over grid axis 1 and accumulated into `acc_ref` (f32).
    The remaining (small) layers run only on the last K step.
    """
    o_ref, acc_ref = refs[-2], refs[-1]
    p = refs[:-2]
    k = pl.program_id(1)
    nk = pl.num_programs(1)

    @pl.when(k == 0)
    def _init():
        acc_ref[...] = jnp.zeros_like(acc_ref)

    # Layer 0 partial product for this K tile: bf16 x bf16 on the MXU, f32 accum.
    acc_ref[...] += jnp.dot(x_ref[...], p[0][...],
                            preferred_element_type=jnp.float32)

    @pl.when(k == nk - 1)
    def _finish():
        # Bias + ReLU in f32 (safe on v5e's f32-only VPU).
        h = jnp.maximum(acc_ref[...] + p[1][...], 0.0)

        # Remaining hidden layers: weights are tiny and fully VMEM-resident.
        for i in range(1, num_hidden):
            w = p[2 * i][...]            # bf16 (h_{i-1}, h_i)
            b = p[2 * i + 1][...]        # f32  (1, h_i)
            h = jnp.dot(h.astype(compute_dtype), w,
                        preferred_element_type=jnp.float32) + b
            h = jnp.maximum(h, 0.0)

        # Final Linear(h_last, 1): VPU broadcast-multiply + XLU lane reduction
        # instead of an N=1-column MXU matmul.
        w_row = p[2 * num_hidden][...]       # f32 (1, h_last)
        b_last = p[2 * num_hidden + 1][...]  # f32 (1, 1)
        logits = jnp.sum(h * w_row, axis=-1, keepdims=True) + b_last
        o_ref[...] = logits.astype(o_ref.dtype)


def init_discriminator_params(key, input_dim: int, hidden_dims: List[int]):
    """Deterministic init mimicking PyTorch nn.Linear default (U[-1/sqrt(fan_in), +])."""
    dims = [input_dim] + list(hidden_dims) + [1]
    params = []
    for i in range(len(dims) - 1):
        fan_in, fan_out = dims[i], dims[i + 1]
        key, kw, kb = jax.random.split(key, 3)
        bound = 1.0 / jnp.sqrt(jnp.float32(fan_in))
        w = jax.random.uniform(kw, (fan_in, fan_out), jnp.float32, -bound, bound)
        b = jax.random.uniform(kb, (fan_out,), jnp.float32, -bound, bound)
        params.append((w, b))
    return params


def discriminator_forward(x, params, *, tb=256, max_tk=512,
                          compute_dtype=jnp.bfloat16):
    """Run the fused MLP Pallas kernel, tiled over batch (parallel) and
    input_dim (reduction) grid axes."""
    assert max_tk % 128 == 0
    B, D = x.shape
    num_hidden = len(params) - 1
    assert num_hidden >= 1, "need at least one hidden layer"
    h0 = params[0][0].shape[1]

    # ---- batch tiling (pad ragged batches; keep >= 2 tiles for v7x megacore) ----
    tb = _round_up(max(8, min(tb, _round_up(B, 8))), 8)
    B_pad = _round_up(B, tb)
    if B > 8 and B_pad // tb < 2:
        tb = _round_up(max(8, B_pad // 2), 8)
        B_pad = _round_up(B, tb)
    nb = B_pad // tb

    # ---- feature (K) tiling for layer 0 ----
    if D <= max_tk:
        tk, D_pad = D, D            # single K tile, block == full feature dim
    else:
        tk = max_tk                 # multiple of 128 -> lane-aligned x blocks
        D_pad = _round_up(D, tk)
    nk = D_pad // tk

    # ---- prepare operands (zero-pad, bf16 for the big streams) ----
    x_p = x
    if (B_pad, D_pad) != (B, D):
        x_p = jnp.pad(x, ((0, B_pad - B), (0, D_pad - D)))
    x_p = x_p.astype(compute_dtype)

    flat_args = []
    in_specs = [pl.BlockSpec((tb, tk), lambda i, k: (i, k))]  # x: batch x K tiles

    # Layer 0: K-tiled weight, f32 bias row.
    w0, b0 = params[0]
    w0_p = w0
    if D_pad != D:
        w0_p = jnp.pad(w0, ((0, D_pad - D), (0, 0)))
    flat_args += [w0_p.astype(compute_dtype), b0.reshape(1, -1).astype(jnp.float32)]
    in_specs += [pl.BlockSpec((tk, h0), lambda i, k: (k, 0)),
                 pl.BlockSpec((1, h0), lambda i, k: (0, 0))]

    # Remaining hidden layers: small, fully resident, bf16 weights / f32 biases.
    for li in range(1, num_hidden):
        w, b = params[li]
        b2d = b.reshape(1, -1).astype(jnp.float32)
        flat_args += [w.astype(compute_dtype), b2d]
        in_specs += [pl.BlockSpec(w.shape, lambda i, k: (0, 0)),
                     pl.BlockSpec(b2d.shape, lambda i, k: (0, 0))]

    # Final Linear(h_last, 1): pass weight as an f32 (1, h_last) row + (1,1) bias.
    w_last, b_last = params[-1]
    w_row = w_last.reshape(1, -1).astype(jnp.float32)   # (1, h_last)
    b_l = b_last.reshape(1, 1).astype(jnp.float32)
    flat_args += [w_row, b_l]
    in_specs += [pl.BlockSpec(w_row.shape, lambda i, k: (0, 0)),
                 pl.BlockSpec((1, 1), lambda i, k: (0, 0))]

    out_spec = pl.BlockSpec((tb, 1), lambda i, k: (i, 0))
    kernel = functools.partial(_mlp_kernel, num_hidden, compute_dtype)

    out = pl.pallas_call(
        kernel,
        out_shape=jax.ShapeDtypeStruct((B_pad, 1), jnp.float32),
        grid=(nb, nk),
        in_specs=in_specs,
        out_specs=out_spec,
        scratch_shapes=[pltpu.VMEM((tb, h0), jnp.float32)],
        compiler_params=pltpu.CompilerParams(
            dimension_semantics=("parallel", "arbitrary"),
            vmem_limit_bytes=32 * 1024 * 1024,
        ),
    )(x_p, *flat_args)

    return out[:B]


def discriminator_forward_ref(x, params, compute_dtype=jnp.bfloat16):
    """Pure-JAX reference with the same bf16-compute / f32-accumulate recipe."""
    num_hidden = len(params) - 1
    h = x.astype(jnp.float32)
    for i in range(num_hidden):
        w, b = params[i]
        h = jnp.dot(h.astype(compute_dtype), w.astype(compute_dtype),
                    preferred_element_type=jnp.float32) + b
        h = jnp.maximum(h, 0.0)
    w, b = params[-1]
    return jnp.dot(h, w.astype(jnp.float32)) + b


if __name__ == "__main__":
    key = jax.random.PRNGKey(0)
    batch = 512              # keeps the batch grid length >= 2 (v7x megacore)
    input_dim = 64           # "number of genes" (kept small for the demo)
    hidden_dims = [32, 16]

    kx, kp = jax.random.split(key)
    x = jax.random.normal(kx, (batch, input_dim), jnp.float32)
    params = init_discriminator_params(kp, input_dim, hidden_dims)

    out = discriminator_forward(x, params, tb=256)
    out = jax.block_until_ready(out)

    ref = discriminator_forward_ref(x, params)
    assert out.shape == (batch, 1)
    max_err = float(jnp.max(jnp.abs(out - ref)))
    assert jnp.allclose(out, ref, atol=1e-2, rtol=1e-2), f"max abs err {max_err}"

    print("KERNEL_OK")
</pallas_src>

<mosaic_0001>
module attributes {stable_mosaic.version = 11 : i64} {
  func.func @_mlp_kernel(%arg0: i32, %arg1: i32, %arg2: memref<256x64xbf16, #tpu.memory_space<vmem>>, %arg3: memref<64x32xbf16, #tpu.memory_space<vmem>>, %arg4: memref<1x32xf32, #tpu.memory_space<vmem>>, %arg5: memref<32x16xbf16, #tpu.memory_space<vmem>>, %arg6: memref<1x16xf32, #tpu.memory_space<vmem>>, %arg7: memref<1x16xf32, #tpu.memory_space<vmem>>, %arg8: memref<1x1xf32, #tpu.memory_space<vmem>>, %arg9: memref<256x1xf32, #tpu.memory_space<vmem>>, %arg10: memref<256x32xf32, #tpu.memory_space<vmem>>) attributes {dimension_semantics = [#tpu.dimension_semantics<parallel>, #tpu.dimension_semantics<arbitrary>], iteration_bounds = array<i64: 2, 1>, scalar_prefetch = 0 : i64, scratch_operands = 1 : i64, tpu.core_type = #tpu.core_type<tc>, window_params = [{transform_indices = @transform_0, window_bounds = array<i64: 256, 64>}, {transform_indices = @transform_1, window_bounds = array<i64: 64, 32>}, {pipeline_mode = #tpu.pipeline_mode<synchronous>, transform_indices = @transform_2, window_bounds = array<i64: 1, 32>}, {pipeline_mode = #tpu.pipeline_mode<synchronous>, transform_indices = @transform_3, window_bounds = array<i64: 32, 16>}, {pipeline_mode = #tpu.pipeline_mode<synchronous>, transform_indices = @transform_4, window_bounds = array<i64: 1, 16>}, {pipeline_mode = #tpu.pipeline_mode<synchronous>, transform_indices = @transform_5, window_bounds = array<i64: 1, 16>}, {pipeline_mode = #tpu.pipeline_mode<synchronous>, transform_indices = @transform_6, window_bounds = array<i64: 1, 1>}, {transform_indices = @transform_7, window_bounds = array<i64: 256, 1>}]} {
    %c0_i32 = arith.constant 0 : i32
    %0 = arith.cmpi eq, %arg1, %c0_i32 : i32
    %1 = arith.extui %0 : i1 to i32
    %c0_i32_0 = arith.constant 0 : i32
    %2 = arith.cmpi ne, %1, %c0_i32_0 : i32
    scf.if %2 {
      %cst_10 = arith.constant 0.000000e+00 : f32
      %12 = vector.broadcast %cst_10 : f32 to vector<256x32xf32>
      %c0_11 = arith.constant 0 : index
      %c0_12 = arith.constant 0 : index
      %13 = vector.load %arg10[%c0_11, %c0_12] : memref<256x32xf32, #tpu.memory_space<vmem>>, vector<256x32xf32>
      tpu.vector_store %arg10[%c0_11, %c0_12], %12 {strides = array<i32>} : memref<256x32xf32, #tpu.memory_space<vmem>>, vector<256x32xf32>,
    } else {
    }
    %c0 = arith.constant 0 : index
    %c0_1 = arith.constant 0 : index
    %3 = vector.load %arg10[%c0, %c0_1] : memref<256x32xf32, #tpu.memory_space<vmem>>, vector<256x32xf32>
    %c0_2 = arith.constant 0 : index
    %c0_3 = arith.constant 0 : index
    %4 = vector.load %arg2[%c0_2, %c0_3] : memref<256x64xbf16, #tpu.memory_space<vmem>>, vector<256x64xbf16>
    %c0_4 = arith.constant 0 : index
    %c0_5 = arith.constant 0 : index
    %5 = vector.load %arg3[%c0_4, %c0_5] : memref<64x32xbf16, #tpu.memory_space<vmem>>, vector<64x32xbf16>
    %cst = arith.constant dense<0.000000e+00> : vector<256x32xf32>
    %6 = tpu.matmul %4, %5, %cst {dimension_numbers = #tpu.dot_dimension_numbers<[1], [0], [0], [1], [0, 0, 1, 1], [], []>} : vector<256x64xbf16>, vector<64x32xbf16>, vector<256x32xf32> -> vector<256x32xf32>
    %7 = arith.addf %3, %6 : vector<256x32xf32>
    %c0_6 = arith.constant 0 : index
    %c0_7 = arith.constant 0 : index
    %8 = vector.load %arg10[%c0_6, %c0_7] : memref<256x32xf32, #tpu.memory_space<vmem>>, vector<256x32xf32>
    tpu.vector_store %arg10[%c0_6, %c0_7], %7 {strides = array<i32>} : memref<256x32xf32, #tpu.memory_space<vmem>>, vector<256x32xf32>,
    %c0_i32_8 = arith.constant 0 : i32
    %9 = arith.cmpi eq, %arg1, %c0_i32_8 : i32
    %10 = arith.extui %9 : i1 to i32
    %c0_i32_9 = arith.constant 0 : i32
    %11 = arith.cmpi ne, %10, %c0_i32_9 : i32
    scf.if %11 {
      %c0_10 = arith.constant 0 : index
      %c0_11 = arith.constant 0 : index
      %12 = vector.load %arg10[%c0_10, %c0_11] : memref<256x32xf32, #tpu.memory_space<vmem>>, vector<256x32xf32>
      %c0_12 = arith.constant 0 : index
      %c0_13 = arith.constant 0 : index
      %13 = vector.load %arg4[%c0_12, %c0_13] : memref<1x32xf32, #tpu.memory_space<vmem>>, vector<1x32xf32>
      %14 = vector.broadcast %13 : vector<1x32xf32> to vector<256x32xf32>
      %15 = arith.addf %12, %14 : vector<256x32xf32>
      %cst_14 = arith.constant 0.000000e+00 : f32
      %16 = vector.broadcast %cst_14 : f32 to vector<256x32xf32>
      %17 = arith.maximumf %15, %16 : vector<256x32xf32>
      %c0_15 = arith.constant 0 : index
      %c0_16 = arith.constant 0 : index
      %18 = vector.load %arg5[%c0_15, %c0_16] : memref<32x16xbf16, #tpu.memory_space<vmem>>, vector<32x16xbf16>
      %c0_17 = arith.constant 0 : index
      %c0_18 = arith.constant 0 : index
      %19 = vector.load %arg6[%c0_17, %c0_18] : memref<1x16xf32, #tpu.memory_space<vmem>>, vector<1x16xf32>
      %20 = arith.truncf %17 : vector<256x32xf32> to vector<256x32xbf16>
      %cst_19 = arith.constant dense<0.000000e+00> : vector<256x16xf32>
      %21 = tpu.matmul %20, %18, %cst_19 {dimension_numbers = #tpu.dot_dimension_numbers<[1], [0], [0], [1], [0, 0, 1, 1], [], []>} : vector<256x32xbf16>, vector<32x16xbf16>, vector<256x16xf32> -> vector<256x16xf32>
      %22 = vector.broadcast %19 : vector<1x16xf32> to vector<256x16xf32>
      %23 = arith.addf %21, %22 : vector<256x16xf32>
      %cst_20 = arith.constant 0.000000e+00 : f32
      %24 = vector.broadcast %cst_20 : f32 to vector<256x16xf32>
      %25 = arith.maximumf %23, %24 : vector<256x16xf32>
      %c0_21 = arith.constant 0 : index
      %c0_22 = arith.constant 0 : index
      %26 = vector.load %arg7[%c0_21, %c0_22] : memref<1x16xf32, #tpu.memory_space<vmem>>, vector<1x16xf32>
      %c0_23 = arith.constant 0 : index
      %c0_24 = arith.constant 0 : index
      %27 = vector.load %arg8[%c0_23, %c0_24] : memref<1x1xf32, #tpu.memory_space<vmem>>, vector<1x1xf32>
      %28 = vector.broadcast %26 : vector<1x16xf32> to vector<256x16xf32>
      %29 = arith.mulf %25, %28 : vector<256x16xf32>
      %cst_25 = arith.constant dense<0.000000e+00> : vector<256xf32>
      %30 = vector.multi_reduction <add>, %29, %cst_25 [1] : vector<256x16xf32> to vector<256xf32>
      %31 = vector.shape_cast %30 : vector<256xf32> to vector<256x1xf32>
      %32 = vector.broadcast %27 : vector<1x1xf32> to vector<256x1xf32>
      %33 = arith.addf %31, %32 : vector<256x1xf32>
      %c0_26 = arith.constant 0 : index
      %c0_27 = arith.constant 0 : index
      %34 = vector.load %arg9[%c0_26, %c0_27] : memref<256x1xf32, #tpu.memory_space<vmem>>, vector<256x1xf32>
      tpu.vector_store %arg9[%c0_26, %c0_27], %33 {strides = array<i32>} : memref<256x1xf32, #tpu.memory_space<vmem>>, vector<256x1xf32>,
    } else {
    }
    return
  }
  func.func @transform_0(%arg0: i32, %arg1: i32) -> (i32, i32) {
    %c0_i32 = arith.constant 0 : i32
    return %arg0, %arg1 : i32, i32
  }
  func.func @transform_1(%arg0: i32, %arg1: i32) -> (i32, i32) {
    %c0_i32 = arith.constant 0 : i32
    %c0_i32_0 = arith.constant 0 : i32
    return %arg1, %c0_i32 : i32, i32
  }
  func.func @transform_2(%arg0: i32, %arg1: i32) -> (i32, i32) {
    %c0_i32 = arith.constant 0 : i32
    %c0_i32_0 = arith.constant 0 : i32
    %c0_i32_1 = arith.constant 0 : i32
    return %c0_i32, %c0_i32_0 : i32, i32
  }
  func.func @transform_3(%arg0: i32, %arg1: i32) -> (i32, i32) {
    %c0_i32 = arith.constant 0 : i32
    %c0_i32_0 = arith.constant 0 : i32
    %c0_i32_1 = arith.constant 0 : i32
    return %c0_i32, %c0_i32_0 : i32, i32
  }
  func.func @transform_4(%arg0: i32, %arg1: i32) -> (i32, i32) {
    %c0_i32 = arith.constant 0 : i32
    %c0_i32_0 = arith.constant 0 : i32
    %c0_i32_1 = arith.constant 0 : i32
    return %c0_i32, %c0_i32_0 : i32, i32
  }
  func.func @transform_5(%arg0: i32, %arg1: i32) -> (i32, i32) {
    %c0_i32 = arith.constant 0 : i32
    %c0_i32_0 = arith.constant 0 : i32
    %c0_i32_1 = arith.constant 0 : i32
    return %c0_i32, %c0_i32_0 : i32, i32
  }
  func.func @transform_6(%arg0: i32, %arg1: i32) -> (i32, i32) {
    %c0_i32 = arith.constant 0 : i32
    %c0_i32_0 = arith.constant 0 : i32
    %c0_i32_1 = arith.constant 0 : i32
    return %c0_i32, %c0_i32_0 : i32, i32
  }
  func.func @transform_7(%arg0: i32, %arg1: i32) -> (i32, i32) {
    %c0_i32 = arith.constant 0 : i32
    %c0_i32_0 = arith.constant 0 : i32
    return %arg0, %c0_i32 : i32, i32
  }
}

</mosaic_0001>

<bundles_post_ra>
// kernel: tpu_custom_call.1
= control target key start
LH: loop header
LB: loop body
LE: loop exit
PB: predicated region body
PF: predicated region fallthrough
CT: control target
= control target key end

     0   :  { %s1596_s26 = smov 0   ;;  %s1598_s27 = smov 0   ;;  %s2008_s0 = inlined_call_operand.vmem [shape: bf16[512,64], index: 0, kind: input, shape index: {}]   ;;  %s2009_s1 = inlined_call_operand.vmem [shape: bf16[64,32], index: 1, kind: input, shape index: {}]   ;;  %s2010_s2 = inlined_call_operand.vmem [shape: f32[1,32], index: 2, kind: input, shape index: {}]   ;;  %s2011_s3 = inlined_call_operand.vmem [shape: bf16[32,16], index: 3, kind: input, shape index: {}]   ;;  %s2012_s4 = inlined_call_operand.vmem [shape: f32[1,16], index: 4, kind: input, shape index: {}]   ;;  %s2013_s5 = inlined_call_operand.vmem [shape: f32[1,16], index: 5, kind: input, shape index: {}]   ;;  %s2014_s6 = inlined_call_operand.<no memory space> [shape: f32[1,1], index: 6, kind: input, shape index: {}]   ;;  %s2015_s7 = inlined_call_operand.vmem [shape: f32[512,1], index: 7, kind: output, shape index: {}]  }
   0x1   :  { %v12_v0 = vstv %s2014_s6  ;;  %s1600_s28 = smov 0  }
   0x2   :  { %13 = vst [vmem:[#allocation3] sm:$0x1] %v12_v0 }
   0x3 LB: > { %s31_s6 = sadd.s32 1, %s1546_s27  ;;  %p1344_p0 = scmp.ge.s32.totalorder %s1550_s28, 1  ;;  %s1550_s28 = sphi %s1600_s28, %s19_s28   ;;  %s1546_s27 = sphi %s1598_s27, %s2017_s27   ;;  %s1542_s26 = sphi %s1596_s26, %s2016_s26  }
   0x4   : > { %p33_p1 = scmp.ge.s32.totalorder %s31_s6, 2  ;;  %p268_p2 = scmp.lt.s32.totalorder %s1550_s28, 3 }
   0x6   : > { %s2019_s6 = smov (%p33_p1, %s31_s6), 0  ;;  %p269_p3 = pnand %p1344_p0, %p268_p2 }
   0x7   : > { %s1345_s8 = sshll.u32 (!%p269_p3), %s1542_s26, 5 }
   0x8   : > { %272 = sbr.rel (%p269_p3) target bundleno = 575 (0x23f), region = 48  ;;  %p309_p4 = scmp.lt.s32.totalorder (!%p269_p3), %s1345_s8, 63 }
   0xd   : > { %v1490_v1 = vld [vmem:[%s2009_s1 + $0x18] sm:$0xff]  ;;  %v1489_v2 = vld [vmem:[%s2009_s1 + $0x10] sm:$0xff]  ;;  %s2021_s8 = smov (!%p309_p4, %s1345_s8), 63  ;;  %v1488_v3 = vld [vmem:[%s2009_s1 + $0x8] sm:$0xff]  ;;  %vm543_vm0 = vcmask 523264   ;;  %vm334_vm1 = vcmask 261120  }
   0xe   : > { %596 = vmatpush.bf16.msra.mxu0 %v1490_v1  ;;  %1493 = vmatpush.bf16.msra.mxu2 %v1490_v1  ;;  %s1346_s13 = sshll.u32 %s2021_s8, 2  ;;  %v1487_v4 = vld [vmem:[%s2009_s1] sm:$0xff]  ;;  %v1552_v17 = vmov 0.0   ;;  %v1492_v22 = vld [vmem:[%s2011_s3 + $0x8] sm:$0xff]  ;;  %vm1091_vm2 = vcmask 130048   ;;  %s1348_s9 = sshll.u32 %s2021_s8, 3 }
   0xf   : > { %s1632_s18 = scalar_lea.vmem %s2008_s0, %s1346_s13  ;;  %335 = vst.msk [vmem:[#allocation2] sm:$0xff] %vm334_vm1, %v1552_v17  ;;  %939 = vmatpush.bf16.msra.mxu1 %v1492_v22  ;;  %1497 = vmatpush.bf16.msra.mxu3 %v1492_v22  ;;  %v1491_v23 = vld [vmem:[%s2011_s3] sm:$0xff]  ;;  %s1884_s12 = scalar_lea.vmem %s2015_s7, %s1348_s9  ;;  %vm1223_vm3 = vcmask 7168  }
  0x10   : > { %v1471_v5 = vld [vmem:[%s1632_s18] sm:$0xff]  ;;  %v1472_v7 = vld [vmem:[%s1632_s18 + $0x8] sm:$0xff]  ;;  %v1473_v9 = vld [vmem:[%s1632_s18 + $0x10] sm:$0xff]  ;;  %336 = vst.msk [vmem:[#allocation2 + $0x8] sm:$0xff] %vm334_vm1, %v1552_v17 }
  0x11   : > { %v1479_v6 = vld [vmem:[%s1632_s18 + $0x40] sm:$0xff]  ;;  %v1480_v8 = vld [vmem:[%s1632_s18 + $0x48] sm:$0xff]  ;;  %v1481_v10 = vld [vmem:[%s1632_s18 + $0x50] sm:$0xff]  ;;  %337 = vst.msk [vmem:[#allocation2 + $0x10] sm:$0xff] %vm334_vm1, %v1552_v17 }
  0x12   : > { %597 = vmatpush.bf16.msra.mxu0 %v1489_v2  ;;  %1494 = vmatpush.bf16.msra.mxu2 %v1489_v2  ;;  %v1474_v11 = vld [vmem:[%s1632_s18 + $0x18] sm:$0xff]  ;;  %v1475_v13 = vld [vmem:[%s1632_s18 + $0x20] sm:$0xff]  ;;  %v1476_v15 = vld [vmem:[%s1632_s18 + $0x28] sm:$0xff]  ;;  %338 = vst.msk [vmem:[#allocation2 + $0x18] sm:$0xff] %vm334_vm1, %v1552_v17 }
  0x13   : > { %v1482_v12 = vld [vmem:[%s1632_s18 + $0x58] sm:$0xff]  ;;  %v1483_v14 = vld [vmem:[%s1632_s18 + $0x60] sm:$0xff]  ;;  %v1484_v16 = vld [vmem:[%s1632_s18 + $0x68] sm:$0xff]  ;;  %339 = vst.msk [vmem:[#allocation2 + $0x20] sm:$0xff] %vm334_vm1, %v1552_v17  ;;  %940 = vmatpush.bf16.msra.mxu1 %v1491_v23  ;;  %1498 = vmatpush.bf16.msra.mxu3 %v1491_v23 }
  0x14   : > { %340 = vst.msk [vmem:[#allocation2 + $0x28] sm:$0xff] %vm334_vm1, %v1552_v17  ;;  %v1477_v18 = vld [vmem:[%s1632_s18 + $0x30] sm:$0xff]  ;;  %v1478_v20 = vld [vmem:[%s1632_s18 + $0x38] sm:$0xff]  ;;  %v1710_v34 = vld [vmem:[%s2010_s2] ss:$0 sm:$0xff] }
  0x15   : > { %341 = vst.msk [vmem:[#allocation2 + $0x30] sm:$0xff] %vm334_vm1, %v1552_v17  ;;  %v1485_v19 = vld [vmem:[%s1632_s18 + $0x70] sm:$0xff]  ;;  %v1486_v21 = vld [vmem:[%s1632_s18 + $0x78] sm:$0xff] }
  0x16   : > { %598 = vmatpush.bf16.msra.mxu0 %v1488_v3  ;;  %1495 = vmatpush.bf16.msra.mxu2 %v1488_v3  ;;  %342 = vst.msk [vmem:[#allocation2 + $0x38] sm:$0xff] %vm334_vm1, %v1552_v17  ;;  %v367_v24 = vld [vmem:[#allocation2] sm:$0xff] }
  0x17   : > { %343 = vst.msk [vmem:[#allocation2 + $0x40] sm:$0xff] %vm334_vm1, %v1552_v17  ;;  %v368_v29 = vld [vmem:[#allocation2 + $0x8] sm:$0xff] }
  0x18   : > { %344 = vst.msk [vmem:[#allocation2 + $0x48] sm:$0xff] %vm334_vm1, %v1552_v17  ;;  %v369_v36 = vld [vmem:[#allocation2 + $0x10] sm:$0xff] }
  0x19   : > { %345 = vst.msk [vmem:[#allocation2 + $0x50] sm:$0xff] %vm334_vm1, %v1552_v17  ;;  %v370_v48 = vld [vmem:[#allocation2 + $0x18] sm:$0xff] }
  0x1a   : > { %599 = vmatpush.bf16.msra.mxu0 %v1487_v4  ;;  %1496 = vmatpush.bf16.msra.mxu2 %v1487_v4  ;;  %346 = vst.msk [vmem:[#allocation2 + $0x58] sm:$0xff] %vm334_vm1, %v1552_v17  ;;  %v371_v55 = vld [vmem:[#allocation2 + $0x20] sm:$0xff] }
  0x1b   : > { %347 = vst.msk [vmem:[#allocation2 + $0x60] sm:$0xff] %vm334_vm1, %v1552_v17 }
  0x1c   : > { %348 = vst.msk [vmem:[#allocation2 + $0x68] sm:$0xff] %vm334_vm1, %v1552_v17 }
  0x1d   : > { %1429 = vmatmul.msk.bf16.vlgmr.msra.gmra.mxu0 %vm543_vm0, %v1471_v5  ;;  %1437 = vmatmul.msk.bf16.vlgmr.msra.gmra.mxu2 %vm543_vm0, %v1479_v6  ;;  %349 = vst.msk [vmem:[#allocation2 + $0x70] sm:$0xff] %vm334_vm1, %v1552_v17  ;;  %v372_v5 = vld [vmem:[#allocation2 + $0x28] sm:$0xff] }
  0x1e   : > { %350 = vst.msk [vmem:[#allocation2 + $0x78] sm:$0xff] %vm334_vm1, %v1552_v17 }
  0x1f   : > { %351 = vst.msk [vmem:[#allocation2 + $0x80] sm:$0xff] %vm334_vm1, %v1552_v17 }
  0x20   : > { %352 = vst.msk [vmem:[#allocation2 + $0x88] sm:$0xff] %vm334_vm1, %v1552_v17 }
  0x21   : > { %353 = vst.msk [vmem:[#allocation2 + $0x90] sm:$0xff] %vm334_vm1, %v1552_v17 }
  0x22   : > { %354 = vst.msk [vmem:[#allocation2 + $0x98] sm:$0xff] %vm334_vm1, %v1552_v17 }
  0x23   : > { %355 = vst.msk [vmem:[#allocation2 + $0xa0] sm:$0xff] %vm334_vm1, %v1552_v17 }
  0x24   : > { %356 = vst.msk [vmem:[#allocation2 + $0xa8] sm:$0xff] %vm334_vm1, %v1552_v17 }
  0x25   : > { %357 = vst.msk [vmem:[#allocation2 + $0xb0] sm:$0xff] %vm334_vm1, %v1552_v17 }
  0x26   : > { %358 = vst.msk [vmem:[#allocation2 + $0xb8] sm:$0xff] %vm334_vm1, %v1552_v17  ;;  %v383_v27 = vld [vmem:[#allocation2 + $0x80] sm:$0xff] }
  0x27   : > { %359 = vst.msk [vmem:[#allocation2 + $0xc0] sm:$0xff] %vm334_vm1, %v1552_v17  ;;  %v384_v33 = vld [vmem:[#allocation2 + $0x88] sm:$0xff] }
  0x28   : > { %360 = vst.msk [vmem:[#allocation2 + $0xc8] sm:$0xff] %vm334_vm1, %v1552_v17  ;;  %v385_v44 = vld [vmem:[#allocation2 + $0x90] sm:$0xff] }
  0x29   : > { %361 = vst.msk [vmem:[#allocation2 + $0xd0] sm:$0xff] %vm334_vm1, %v1552_v17  ;;  %v386_v53 = vld [vmem:[#allocation2 + $0x98] sm:$0xff] }
  0x2a   : > { %362 = vst.msk [vmem:[#allocation2 + $0xd8] sm:$0xff] %vm334_vm1, %v1552_v17  ;;  %v387_v0 = vld [vmem:[#allocation2 + $0xa0] sm:$0xff] }
  0x2b   : > { %363 = vst.msk [vmem:[#allocation2 + $0xe0] sm:$0xff] %vm334_vm1, %v1552_v17 }
  0x2c   : > { %364 = vst.msk [vmem:[#allocation2 + $0xe8] sm:$0xff] %vm334_vm1, %v1552_v17 }
  0x2d   : > { %1430 = vmatmul.msk.bf16.gmra.mxu0 %vm543_vm0, %v1472_v7  ;;  %1438 = vmatmul.msk.bf16.gmra.mxu2 %vm543_vm0, %v1480_v8  ;;  %365 = vst.msk [vmem:[#allocation2 + $0xf0] sm:$0xff] %vm334_vm1, %v1552_v17 }
  0x2e   : > { %366 = vst.msk [vmem:[#allocation2 + $0xf8] sm:$0xff] %vm334_vm1, %v1552_v17  ;;  %v373_v17 = vld [vmem:[#allocation2 + $0x30] sm:$0xff] }
  0x3d   : > { %1431 = vmatmul.msk.bf16.gmra.mxu0 %vm543_vm0, %v1473_v9  ;;  %1439 = vmatmul.msk.bf16.gmra.mxu2 %vm543_vm0, %v1481_v10 }
  0x4d   : > { %1432 = vmatmul.msk.bf16.gmra.mxu0 %vm543_vm0, %v1474_v11  ;;  %1440 = vmatmul.msk.bf16.gmra.mxu2 %vm543_vm0, %v1482_v12 }
  0x5d   : > { %1433 = vmatmul.msk.bf16.gmra.mxu0 %vm543_vm0, %v1475_v13  ;;  %1441 = vmatmul.msk.bf16.gmra.mxu2 %vm543_vm0, %v1483_v14  ;;  %v388_v14 = vld [vmem:[#allocation2 + $0xa8] sm:$0xff] }
  0x6d   : > { %1434 = vmatmul.msk.bf16.gmra.mxu0 %vm543_vm0, %v1476_v15  ;;  %1442 = vmatmul.msk.bf16.gmra.mxu2 %vm543_vm0, %v1484_v16 }
  0x7d   : > { %1435 = vmatmul.msk.bf16.gmra.mxu0 %vm543_vm0, %v1477_v18  ;;  %1443 = vmatmul.msk.bf16.gmra.mxu2 %vm543_vm0, %v1485_v19 }
  0x8d   : > { %1436 = vmatmul.msk.bf16.gmra.mxu0 %vm543_vm0, %v1478_v20  ;;  %1444 = vmatmul.msk.bf16.gmra.mxu2 %vm543_vm0, %v1486_v21 }
  0x9a   : > { %v601_v25 = vpop.f32.mrf.mxu0 }
  0x9b   : > { %v681_v26 = vadd.f32 %v601_v25, %v367_v24 }
  0x9d   : > { %714 = vst.msk [vmem:[#allocation2] sm:$0xff] %vm334_vm1, %v681_v26  ;;  %v389_v26 = vld [vmem:[#allocation2 + $0xb0] sm:$0xff] }
  0xa0   : > { %v641_v28 = vpop.f32.mrf.mxu2 }
  0xa1   : > { %v697_v30 = vadd.f32 %v641_v28, %v383_v27 }
  0xa2   : > { %v603_v31 = vpop.f32.mrf.mxu0 }
  0xa3   : > { %730 = vst.msk [vmem:[#allocation2 + $0x80] sm:$0xff] %vm334_vm1, %v697_v30  ;;  %v682_v32 = vadd.f32 %v603_v31, %v368_v29  ;;  %v374_v31 = vld [vmem:[#allocation2 + $0x38] sm:$0xff] }
  0xa4   : > { %v749_v37 = vld [vmem:[#allocation2] sm:$0xff] }
  0xa5   : > { %715 = vst.msk [vmem:[#allocation2 + $0x8] sm:$0xff] %vm334_vm1, %v682_v32  ;;  %v785_v41 = vadd.f32 %v1710_v34, %v749_v37 }
  0xa7   : > { %v817_v45 = vmax.f32 %v785_v41, 0.0  ;;  %v390_v41 = vld [vmem:[#allocation2 + $0xb8] sm:$0xff] }
  0xa8   : > { %v643_v35 = vpop.f32.mrf.mxu2 }
  0xa9   : > { %v698_v38 = vadd.f32 %v643_v35, %v384_v33 }
  0xaa   : > { %v606_v39 = vpop.f32.mrf.mxu0 }
  0xab   : > { %731 = vst.msk [vmem:[#allocation2 + $0x88] sm:$0xff] %vm334_vm1, %v698_v38  ;;  %v683_v40 = vadd.f32 %v606_v39, %v369_v36 }
  0xac   : > { %v750_v42 = vld [vmem:[#allocation2 + $0x8] sm:$0xff] }
  0xad   : > { %716 = vst.msk [vmem:[#allocation2 + $0x10] sm:$0xff] %vm334_vm1, %v683_v40  ;;  %v786_v43 = vadd.f32 %v1710_v34, %v750_v42 }
  0xaf   : > { %v818_v46 = vmax.f32 %v786_v43, 0.0 }
  0xb0   : > { %v646_v47 = vpop.f32.mrf.mxu2 }
  0xb1   : > { %v699_v49 = vadd.f32 %v646_v47, %v385_v44  ;;  %v854_v50 = vpack.c.bf16 %v818_v46, %v817_v45  ;;  %v375_v44 = vld [vmem:[#allocation2 + $0x40] sm:$0xff] }
  0xb2   : > { %v608_v51 = vpop.f32.mrf.mxu0 }
  0xb3   : > { %732 = vst.msk [vmem:[#allocation2 + $0x90] sm:$0xff] %vm334_vm1, %v699_v49  ;;  %v684_v52 = vadd.f32 %v608_v51, %v370_v48  ;;  %1453 = vmatmul.msk.bf16.vlgmr.msra.gmra.mxu1 %vm334_vm1, %v854_v50 }
  0xb4   : > { %v751_v56 = vld [vmem:[#allocation2 + $0x10] sm:$0xff] }
  0xb5   : > { %717 = vst.msk [vmem:[#allocation2 + $0x18] sm:$0xff] %vm334_vm1, %v684_v52  ;;  %v787_v60 = vadd.f32 %v1710_v34, %v751_v56 }
  0xb7   : > { %v819_v1 = vmax.f32 %v787_v60, 0.0 }
  0xb8   : > { %v648_v54 = vpop.f32.mrf.mxu2 }
  0xb9   : > { %v700_v57 = vadd.f32 %v648_v54, %v386_v53  ;;  %v391_v53 = vld [vmem:[#allocation2 + $0xc0] sm:$0xff] }
  0xba   : > { %v611_v58 = vpop.f32.mrf.mxu0  ;;  %v767_v62 = vld [vmem:[#allocation2 + $0x90] sm:$0xff] }
  0xbb   : > { %733 = vst.msk [vmem:[#allocation2 + $0x98] sm:$0xff] %vm334_vm1, %v700_v57  ;;  %v685_v59 = vadd.f32 %v611_v58, %v371_v55  ;;  %v803_v3 = vadd.f32 %v1710_v34, %v767_v62  ;;  %v376_v58 = vld [vmem:[#allocation2 + $0x48] sm:$0xff] }
  0xbc   : > { %v752_v61 = vld [vmem:[#allocation2 + $0x18] sm:$0xff] }
  0xbd   : > { %718 = vst.msk [vmem:[#allocation2 + $0x20] sm:$0xff] %vm334_vm1, %v685_v59  ;;  %v788_v63 = vadd.f32 %v1710_v34, %v752_v61  ;;  %v835_v12 = vmax.f32 %v803_v3, 0.0  ;;  %v392_v3 = vld [vmem:[#allocation2 + $0xc8] sm:$0xff] }
  0xbf   : > { %v820_v2 = vmax.f32 %v788_v63, 0.0 }
  0xc0   : > { %v651_v4 = vpop.f32.mrf.mxu2 }
  0xc1   : > { %v701_v6 = vadd.f32 %v651_v4, %v387_v0  ;;  %v855_v7 = vpack.c.bf16 %v820_v2, %v819_v1 }
  0xc2   : > { %v613_v8 = vpop.f32.mrf.mxu0  ;;  %v768_v9 = vld [vmem:[#allocation2 + $0x98] sm:$0xff] }
  0xc3   : > { %734 = vst.msk [vmem:[#allocation2 + $0xa0] sm:$0xff] %vm334_vm1, %v701_v6  ;;  %v686_v10 = vadd.f32 %v613_v8, %v372_v5  ;;  %1454 = vmatmul.msk.bf16.gmra.mxu1 %vm334_vm1, %v855_v7  ;;  %v804_v11 = vadd.f32 %v1710_v34, %v768_v9  ;;  %v377_v6 = vld [vmem:[#allocation2 + $0x50] sm:$0xff] }
  0xc4   : > { %v753_v18 = vld [vmem:[#allocation2 + $0x20] sm:$0xff] }
  0xc5   : > { %719 = vst.msk [vmem:[#allocation2 + $0x28] sm:$0xff] %vm334_vm1, %v686_v10  ;;  %v836_v13 = vmax.f32 %v804_v11, 0.0  ;;  %v789_v22 = vadd.f32 %v1710_v34, %v753_v18 }
  0xc7   : > { %v863_v15 = vpack.c.bf16 %v836_v13, %v835_v12  ;;  %v821_v27 = vmax.f32 %v789_v22, 0.0 }
  0xc8   : > { %v653_v16 = vpop.f32.mrf.mxu2 }
  0xc9   : > { %v702_v19 = vadd.f32 %v653_v16, %v388_v14  ;;  %1462 = vmatmul.msk.bf16.vlgmr.msra.gmra.mxu3 %vm334_vm1, %v863_v15  ;;  %v393_v15 = vld [vmem:[#allocation2 + $0xd0] sm:$0xff] }
  0xca   : > { %v616_v20 = vpop.f32.mrf.mxu0  ;;  %v769_v24 = vld [vmem:[#allocation2 + $0xa0] sm:$0xff] }
  0xcb   : > { %735 = vst.msk [vmem:[#allocation2 + $0xa8] sm:$0xff] %vm334_vm1, %v702_v19  ;;  %v687_v21 = vadd.f32 %v616_v20, %v373_v17  ;;  %v805_v29 = vadd.f32 %v1710_v34, %v769_v24  ;;  %v378_v20 = vld [vmem:[#allocation2 + $0x58] sm:$0xff] }
  0xcc   : > { %v754_v23 = vld [vmem:[#allocation2 + $0x28] sm:$0xff] }
  0xcd   : > { %720 = vst.msk [vmem:[#allocation2 + $0x30] sm:$0xff] %vm334_vm1, %v687_v21  ;;  %v790_v25 = vadd.f32 %v1710_v34, %v754_v23  ;;  %v837_v39 = vmax.f32 %v805_v29, 0.0  ;;  %v394_v29 = vld [vmem:[#allocation2 + $0xd8] sm:$0xff] }
  0xcf   : > { %v822_v28 = vmax.f32 %v790_v25, 0.0 }
  0xd0   : > { %v656_v30 = vpop.f32.mrf.mxu2 }
  0xd1   : > { %v703_v32 = vadd.f32 %v656_v30, %v389_v26  ;;  %v856_v33 = vpack.c.bf16 %v822_v28, %v821_v27 }
  0xd2   : > { %v618_v35 = vpop.f32.mrf.mxu0  ;;  %v770_v36 = vld [vmem:[#allocation2 + $0xa8] sm:$0xff] }
  0xd3   : > { %736 = vst.msk [vmem:[#allocation2 + $0xb0] sm:$0xff] %vm334_vm1, %v703_v32  ;;  %v688_v37 = vadd.f32 %v618_v35, %v374_v31  ;;  %1455 = vmatmul.msk.bf16.gmra.mxu1 %vm334_vm1, %v856_v33  ;;  %v806_v38 = vadd.f32 %v1710_v34, %v770_v36  ;;  %v379_v32 = vld [vmem:[#allocation2 + $0x60] sm:$0xff] }
  0xd4   : > { %v755_v45 = vld [vmem:[#allocation2 + $0x30] sm:$0xff] }
  0xd5   : > { %721 = vst.msk [vmem:[#allocation2 + $0x38] sm:$0xff] %vm334_vm1, %v688_v37  ;;  %v838_v40 = vmax.f32 %v806_v38, 0.0  ;;  %v791_v49 = vadd.f32 %v1710_v34, %v755_v45 }
  0xd7   : > { %v864_v42 = vpack.c.bf16 %v838_v40, %v837_v39  ;;  %v823_v54 = vmax.f32 %v791_v49, 0.0 }
  0xd8   : > { %v658_v43 = vpop.f32.mrf.mxu2 }
  0xd9   : > { %v704_v46 = vadd.f32 %v658_v43, %v390_v41  ;;  %1463 = vmatmul.msk.bf16.gmra.mxu3 %vm334_vm1, %v864_v42  ;;  %v395_v42 = vld [vmem:[#allocation2 + $0xe0] sm:$0xff] }
  0xda   : > { %v621_v47 = vpop.f32.mrf.mxu0  ;;  %v771_v51 = vld [vmem:[#allocation2 + $0xb0] sm:$0xff] }
  0xdb   : > { %737 = vst.msk [vmem:[#allocation2 + $0xb8] sm:$0xff] %vm334_vm1, %v704_v46  ;;  %v689_v48 = vadd.f32 %v621_v47, %v375_v44  ;;  %v807_v56 = vadd.f32 %v1710_v34, %v771_v51  ;;  %v380_v47 = vld [vmem:[#allocation2 + $0x68] sm:$0xff] }
  0xdc   : > { %v756_v50 = vld [vmem:[#allocation2 + $0x38] sm:$0xff] }
  0xdd   : > { %722 = vst.msk [vmem:[#allocation2 + $0x40] sm:$0xff] %vm334_vm1, %v689_v48  ;;  %v792_v52 = vadd.f32 %v1710_v34, %v756_v50  ;;  %v839_v1 = vmax.f32 %v807_v56, 0.0  ;;  %v396_v56 = vld [vmem:[#allocation2 + $0xe8] sm:$0xff] }
  0xdf   : > { %v824_v55 = vmax.f32 %v792_v52, 0.0 }
  0xe0   : > { %v661_v57 = vpop.f32.mrf.mxu2 }
  0xe1   : > { %v705_v59 = vadd.f32 %v661_v57, %v391_v53  ;;  %v857_v60 = vpack.c.bf16 %v824_v55, %v823_v54 }
  0xe2   : > { %v623_v61 = vpop.f32.mrf.mxu0  ;;  %v772_v62 = vld [vmem:[#allocation2 + $0xb8] sm:$0xff] }
  0xe3   : > { %738 = vst.msk [vmem:[#allocation2 + $0xc0] sm:$0xff] %vm334_vm1, %v705_v59  ;;  %v690_v63 = vadd.f32 %v623_v61, %v376_v58  ;;  %1456 = vmatmul.msk.bf16.gmra.mxu1 %vm334_vm1, %v857_v60  ;;  %v808_v0 = vadd.f32 %v1710_v34, %v772_v62  ;;  %v381_v59 = vld [vmem:[#allocation2 + $0x70] sm:$0xff] }
  0xe4   : > { %v757_v7 = vld [vmem:[#allocation2 + $0x40] sm:$0xff] }
  0xe5   : > { %723 = vst.msk [vmem:[#allocation2 + $0x48] sm:$0xff] %vm334_vm1, %v690_v63  ;;  %v840_v2 = vmax.f32 %v808_v0, 0.0  ;;  %v793_v11 = vadd.f32 %v1710_v34, %v757_v7 }
  0xe7   : > { %v865_v4 = vpack.c.bf16 %v840_v2, %v839_v1  ;;  %v825_v16 = vmax.f32 %v793_v11, 0.0 }
  0xe8   : > { %v663_v5 = vpop.f32.mrf.mxu2 }
  0xe9   : > { %v706_v8 = vadd.f32 %v663_v5, %v392_v3  ;;  %1464 = vmatmul.msk.bf16.gmra.mxu3 %vm334_vm1, %v865_v4  ;;  %v397_v4 = vld [vmem:[#allocation2 + $0xf0] sm:$0xff] }
  0xea   : > { %v626_v9 = vpop.f32.mrf.mxu0  ;;  %v773_v13 = vld [vmem:[#allocation2 + $0xc0] sm:$0xff] }
  0xeb   : > { %739 = vst.msk [vmem:[#allocation2 + $0xc8] sm:$0xff] %vm334_vm1, %v706_v8  ;;  %v691_v10 = vadd.f32 %v626_v9, %v377_v6  ;;  %v809_v18 = vadd.f32 %v1710_v34, %v773_v13  ;;  %v382_v9 = vld [vmem:[#allocation2 + $0x78] sm:$0xff] }
  0xec   : > { %v758_v12 = vld [vmem:[#allocation2 + $0x48] sm:$0xff] }
  0xed   : > { %724 = vst.msk [vmem:[#allocation2 + $0x50] sm:$0xff] %vm334_vm1, %v691_v10  ;;  %v794_v14 = vadd.f32 %v1710_v34, %v758_v12  ;;  %v841_v27 = vmax.f32 %v809_v18, 0.0  ;;  %v398_v18 = vld [vmem:[#allocation2 + $0xf8] sm:$0xff] }
  0xef   : > { %v826_v17 = vmax.f32 %v794_v14, 0.0 }
  0xf0   : > { %v666_v19 = vpop.f32.mrf.mxu2 }
  0xf1   : > { %v707_v21 = vadd.f32 %v666_v19, %v393_v15  ;;  %v858_v22 = vpack.c.bf16 %v826_v17, %v825_v16 }
  0xf2   : > { %v628_v23 = vpop.f32.mrf.mxu0  ;;  %v774_v24 = vld [vmem:[#allocation2 + $0xc8] sm:$0xff] }
  0xf3   : > { %740 = vst.msk [vmem:[#allocation2 + $0xd0] sm:$0xff] %vm334_vm1, %v707_v21  ;;  %v692_v25 = vadd.f32 %v628_v23, %v378_v20  ;;  %1457 = vmatmul.msk.bf16.gmra.mxu1 %vm334_vm1, %v858_v22  ;;  %v810_v26 = vadd.f32 %v1710_v34, %v774_v24 }
  0xf4   : > { %v759_v33 = vld [vmem:[#allocation2 + $0x50] sm:$0xff] }
  0xf5   : > { %725 = vst.msk [vmem:[#allocation2 + $0x58] sm:$0xff] %vm334_vm1, %v692_v25  ;;  %v842_v28 = vmax.f32 %v810_v26, 0.0  ;;  %v795_v38 = vadd.f32 %v1710_v34, %v759_v33 }
  0xf7   : > { %v866_v30 = vpack.c.bf16 %v842_v28, %v841_v27  ;;  %v827_v43 = vmax.f32 %v795_v38, 0.0 }
  0xf8   : > { %v668_v31 = vpop.f32.mrf.mxu2 }
  0xf9   : > { %v708_v35 = vadd.f32 %v668_v31, %v394_v29  ;;  %1465 = vmatmul.msk.bf16.gmra.mxu3 %vm334_vm1, %v866_v30 }
  0xfa   : > { %v631_v36 = vpop.f32.mrf.mxu0  ;;  %v775_v40 = vld [vmem:[#allocation2 + $0xd0] sm:$0xff] }
  0xfb   : > { %741 = vst.msk [vmem:[#allocation2 + $0xd8] sm:$0xff] %vm334_vm1, %v708_v35  ;;  %v693_v37 = vadd.f32 %v631_v36, %v379_v32  ;;  %v811_v45 = vadd.f32 %v1710_v34, %v775_v40  ;;  %v765_v36 = vld [vmem:[#allocation2 + $0x80] sm:$0xff] }
  0xfc   : > { %v760_v39 = vld [vmem:[#allocation2 + $0x58] sm:$0xff] }
  0xfd   : > { %726 = vst.msk [vmem:[#allocation2 + $0x60] sm:$0xff] %vm334_vm1, %v693_v37  ;;  %v796_v41 = vadd.f32 %v1710_v34, %v760_v39  ;;  %v843_v54 = vmax.f32 %v811_v45, 0.0  ;;  %v766_v37 = vld [vmem:[#allocation2 + $0x88] sm:$0xff]  ;;  %v801_v39 = vadd.f32 %v1710_v34, %v765_v36 }
  0xfe   : > { %v802_v40 = vadd.f32 %v1710_v34, %v766_v37 }
  0xff   : > { %v828_v44 = vmax.f32 %v796_v41, 0.0  ;;  %v1791_v41 = vld [vmem:[%s2012_s4] ss:$0 sm:$0xff] }
 0x100   : > { %v671_v46 = vpop.f32.mrf.mxu2 }
 0x101   : > { %v709_v48 = vadd.f32 %v671_v46, %v395_v42  ;;  %v859_v49 = vpack.c.bf16 %v828_v44, %v827_v43  ;;  %v833_v42 = vmax.f32 %v801_v39, 0.0  ;;  %v834_v43 = vmax.f32 %v802_v40, 0.0 }
 0x102   : > { %v633_v50 = vpop.f32.mrf.mxu0  ;;  %v776_v51 = vld [vmem:[#allocation2 + $0xd8] sm:$0xff] }
 0x103   : > { %742 = vst.msk [vmem:[#allocation2 + $0xe0] sm:$0xff] %vm334_vm1, %v709_v48  ;;  %v694_v52 = vadd.f32 %v633_v50, %v380_v47  ;;  %1458 = vmatmul.msk.bf16.gmra.mxu1 %vm334_vm1, %v859_v49  ;;  %v812_v53 = vadd.f32 %v1710_v34, %v776_v51  ;;  %v862_v46 = vpack.c.bf16 %v834_v43, %v833_v42  ;;  %v1797_v47 = vld [vmem:[%s2013_s5] ss:$0 sm:$0xff] }
 0x104   : > { %v761_v60 = vld [vmem:[#allocation2 + $0x60] sm:$0xff] }
 0x105   : > { %727 = vst.msk [vmem:[#allocation2 + $0x68] sm:$0xff] %vm334_vm1, %v694_v52  ;;  %v844_v55 = vmax.f32 %v812_v53, 0.0  ;;  %v797_v0 = vadd.f32 %v1710_v34, %v761_v60 }
 0x107   : > { %v867_v57 = vpack.c.bf16 %v844_v55, %v843_v54  ;;  %v829_v5 = vmax.f32 %v797_v0, 0.0 }
 0x108   : > { %v673_v58 = vpop.f32.mrf.mxu2 }
 0x109   : > { %v710_v61 = vadd.f32 %v673_v58, %v396_v56  ;;  %1466 = vmatmul.msk.bf16.gmra.mxu3 %vm334_vm1, %v867_v57 }
 0x10a   : > { %v636_v62 = vpop.f32.mrf.mxu0  ;;  %v777_v2 = vld [vmem:[#allocation2 + $0xe0] sm:$0xff] }
 0x10b   : > { %743 = vst.msk [vmem:[#allocation2 + $0xe8] sm:$0xff] %vm334_vm1, %v710_v61  ;;  %v695_v63 = vadd.f32 %v636_v62, %v381_v59  ;;  %v813_v7 = vadd.f32 %v1710_v34, %v777_v2 }
 0x10c   : > { %v762_v1 = vld [vmem:[#allocation2 + $0x68] sm:$0xff] }
 0x10d   : > { %728 = vst.msk [vmem:[#allocation2 + $0x70] sm:$0xff] %vm334_vm1, %v695_v63  ;;  %v798_v3 = vadd.f32 %v1710_v34, %v762_v1  ;;  %v845_v16 = vmax.f32 %v813_v7, 0.0 }
 0x10f   : > { %v830_v6 = vmax.f32 %v798_v3, 0.0 }
 0x110   : > { %v676_v8 = vpop.f32.mrf.mxu2 }
 0x111   : > { %v711_v10 = vadd.f32 %v676_v8, %v397_v4  ;;  %v860_v11 = vpack.c.bf16 %v830_v6, %v829_v5 }
 0x112   : > { %v638_v12 = vpop.f32.mrf.mxu0  ;;  %v778_v13 = vld [vmem:[#allocation2 + $0xe8] sm:$0xff] }
 0x113   : > { %744 = vst.msk [vmem:[#allocation2 + $0xf0] sm:$0xff] %vm334_vm1, %v711_v10  ;;  %v696_v14 = vadd.f32 %v638_v12, %v382_v9  ;;  %1459 = vmatmul.msk.bf16.gmra.mxu1 %vm334_vm1, %v860_v11  ;;  %v814_v15 = vadd.f32 %v1710_v34, %v778_v13 }
 0x114   : > { %v763_v21 = vld [vmem:[#allocation2 + $0x70] sm:$0xff] }
 0x115   : > { %729 = vst.msk [vmem:[#allocation2 + $0x78] sm:$0xff] %vm334_vm1, %v696_v14  ;;  %v846_v17 = vmax.f32 %v814_v15, 0.0  ;;  %v799_v23 = vadd.f32 %v1710_v34, %v763_v21 }
 0x117   : > { %v868_v19 = vpack.c.bf16 %v846_v17, %v845_v16  ;;  %v831_v27 = vmax.f32 %v799_v23, 0.0 }
 0x118   : > { %v678_v20 = vpop.f32.mrf.mxu2 }
 0x119   : > { %v712_v22 = vadd.f32 %v678_v20, %v398_v18  ;;  %1467 = vmatmul.msk.bf16.gmra.mxu3 %vm334_vm1, %v868_v19 }
 0x11a   : > { %v779_v25 = vld [vmem:[#allocation2 + $0xf0] sm:$0xff] }
 0x11b   : > { %745 = vst.msk [vmem:[#allocation2 + $0xf8] sm:$0xff] %vm334_vm1, %v712_v22  ;;  %v815_v29 = vadd.f32 %v1710_v34, %v779_v25 }
 0x11c   : > { %v764_v24 = vld [vmem:[#allocation2 + $0x78] sm:$0xff] }
 0x11d   : > { %v800_v26 = vadd.f32 %v1710_v34, %v764_v24  ;;  %v847_v33 = vmax.f32 %v815_v29, 0.0 }
 0x11f   : > { %v832_v28 = vmax.f32 %v800_v26, 0.0 }
 0x121   : > { %v861_v30 = vpack.c.bf16 %v832_v28, %v831_v27 }
 0x122   : > { %v780_v31 = vld [vmem:[#allocation2 + $0xf8] sm:$0xff] }
 0x123   : > { %1460 = vmatmul.msk.bf16.gmra.mxu1 %vm334_vm1, %v861_v30  ;;  %v816_v32 = vadd.f32 %v1710_v34, %v780_v31 }
 0x125   : > { %v848_v35 = vmax.f32 %v816_v32, 0.0 }
 0x127   : > { %v869_v38 = vpack.c.bf16 %v848_v35, %v847_v33 }
 0x129   : > { %1468 = vmatmul.msk.bf16.gmra.mxu3 %vm334_vm1, %v869_v38 }
 0x130   : > { %v942_v44 = vpop.f32.mrf.mxu1 }
 0x131   : > { %v943_v45 = vadd.f32 %v1791_v41, %v942_v44 }
 0x133   : > { %v1022_v48 = vmax.f32 %v943_v45, 0.0  ;;  %1461 = vmatmul.msk.bf16.gmra.mxu1 %vm334_vm1, %v862_v46 }
 0x135   : > { %v1059_v34 = vmul.f32 %v1797_v47, %v1022_v48 }
 0x137   : > { %v1092_v49 = vsel %vm1091_vm2, %v1059_v34, 0.0 }
 0x138   : > { %v944_v50 = vpop.f32.mrf.mxu1  ;;  %1093 = vadd.xlane.f32.xlu0 %v1092_v49 }
 0x139   : > { %v945_v51 = vadd.f32 %v1791_v41, %v944_v50 }
 0x13b   : > { %v1023_v52 = vmax.f32 %v945_v51, 0.0 }
 0x13d   : > { %v1060_v53 = vmul.f32 %v1797_v47, %v1023_v52 }
 0x13f   : > { %v1095_v54 = vsel %vm1091_vm2, %v1060_v53, 0.0 }
 0x140   : > { %1096 = vadd.xlane.f32.xlu0 %v1095_v54  ;;  %v947_v55 = vpop.f32.mrf.mxu1 }
 0x141   : > { %v948_v56 = vadd.f32 %v1791_v41, %v947_v55 }
 0x143   : > { %v1024_v57 = vmax.f32 %v948_v56, 0.0 }
 0x145   : > { %v1061_v58 = vmul.f32 %v1797_v47, %v1024_v57 }
 0x147   : > { %v1098_v59 = vsel %vm1091_vm2, %v1061_v58, 0.0 }
 0x148   : > { %v949_v60 = vpop.f32.mrf.mxu1  ;;  %1099 = vadd.xlane.f32.xlu1 %v1098_v59 }
 0x149   : > { %v950_v61 = vadd.f32 %v1791_v41, %v949_v60 }
 0x14b   : > { %v1025_v62 = vmax.f32 %v950_v61, 0.0 }
 0x14c   : > { %v987_v63 = vpop.f32.mrf.mxu3 }
 0x14d   : > { %v988_v0 = vadd.f32 %v1791_v41, %v987_v63  ;;  %v1062_v1 = vmul.f32 %v1797_v47, %v1025_v62 }
 0x14f   : > { %v1040_v2 = vmax.f32 %v988_v0, 0.0  ;;  %v1101_v3 = vsel %vm1091_vm2, %v1062_v1, 0.0 }
 0x150   : > { %1102 = vadd.xlane.f32.xlu1 %v1101_v3  ;;  %v952_v4 = vpop.f32.mrf.mxu1 }
 0x151   : > { %v953_v5 = vadd.f32 %v1791_v41, %v952_v4  ;;  %v1077_v6 = vmul.f32 %v1797_v47, %v1040_v2 }
 0x153   : > { %v1026_v7 = vmax.f32 %v953_v5, 0.0  ;;  %v1146_v8 = vsel %vm1091_vm2, %v1077_v6, 0.0 }
 0x154   : > { %v989_v9 = vpop.f32.mrf.mxu3  ;;  %1147 = vadd.xlane.f32.xlu0 %v1146_v8 }
 0x155   : > { %v990_v10 = vadd.f32 %v1791_v41, %v989_v9  ;;  %v1063_v11 = vmul.f32 %v1797_v47, %v1026_v7 }
 0x157   : > { %v1041_v12 = vmax.f32 %v990_v10, 0.0  ;;  %v1104_v13 = vsel %vm1091_vm2, %v1063_v11, 0.0 }
 0x158   : > { %v954_v14 = vpop.f32.mrf.mxu1  ;;  %1105 = vadd.xlane.f32.xlu2 %v1104_v13 }
 0x159   : > { %v955_v15 = vadd.f32 %v1791_v41, %v954_v14  ;;  %v1078_v16 = vmul.f32 %v1797_v47, %v1041_v12 }
 0x15b   : > { %v1027_v17 = vmax.f32 %v955_v15, 0.0  ;;  %v1149_v18 = vsel %vm1091_vm2, %v1078_v16, 0.0 }
 0x15c   : > { %v992_v19 = vpop.f32.mrf.mxu3  ;;  %1150 = vadd.xlane.f32.xlu1 %v1149_v18 }
 0x15d   : > { %v993_v20 = vadd.f32 %v1791_v41, %v992_v19  ;;  %v1064_v21 = vmul.f32 %v1797_v47, %v1027_v17 }
 0x15f   : > { %v1042_v22 = vmax.f32 %v993_v20, 0.0  ;;  %v1107_v23 = vsel %vm1091_vm2, %v1064_v21, 0.0 }
 0x160   : > { %1108 = vadd.xlane.f32.xlu2 %v1107_v23  ;;  %v957_v24 = vpop.f32.mrf.mxu1 }
 0x161   : > { %v958_v25 = vadd.f32 %v1791_v41, %v957_v24  ;;  %v1079_v26 = vmul.f32 %v1797_v47, %v1042_v22 }
 0x163   : > { %v1028_v27 = vmax.f32 %v958_v25, 0.0  ;;  %v1152_v30 = vsel %vm1091_vm2, %v1079_v26, 0.0 }
 0x164   : > { %v994_v28 = vpop.f32.mrf.mxu3 }
 0x165   : > { %v995_v29 = vadd.f32 %v1791_v41, %v994_v28  ;;  %v1065_v31 = vmul.f32 %v1797_v47, %v1028_v27 }
 0x167   : > { %v1043_v32 = vmax.f32 %v995_v29, 0.0  ;;  %v1110_v33 = vsel %vm1091_vm2, %v1065_v31, 0.0 }
 0x168   : > { %1153 = vadd.xlane.f32.xlu2 %v1152_v30  ;;  %v959_v35 = vpop.f32.mrf.mxu1  ;;  %1111 = vadd.xlane.f32.xlu0 %v1110_v33 }
 0x169   : > { %v960_v36 = vadd.f32 %v1791_v41, %v959_v35  ;;  %v1080_v38 = vmul.f32 %v1797_v47, %v1043_v32 }
 0x16b   : > { %v1029_v37 = vmax.f32 %v960_v36, 0.0  ;;  %v1155_v45 = vsel %vm1091_vm2, %v1080_v38, 0.0 }
 0x16c   : > { %v997_v39 = vpop.f32.mrf.mxu3 }
 0x16d   : > { %v998_v40 = vadd.f32 %v1791_v41, %v997_v39  ;;  %v1066_v42 = vmul.f32 %v1797_v47, %v1029_v37 }
 0x16f   : > { %v1044_v43 = vmax.f32 %v998_v40, 0.0  ;;  %v1113_v44 = vsel %vm1091_vm2, %v1066_v42, 0.0 }
 0x170   : > { %1114 = vadd.xlane.f32.xlu1 %v1113_v44  ;;  %1156 = vadd.xlane.f32.xlu0 %v1155_v45  ;;  %v962_v46 = vpop.f32.mrf.mxu1 }
 0x171   : > { %v963_v48 = vadd.f32 %v1791_v41, %v962_v46  ;;  %v1081_v34 = vmul.f32 %v1797_v47, %v1044_v43 }
 0x173   : > { %v1030_v49 = vmax.f32 %v963_v48, 0.0  ;;  %v1158_v52 = vsel %vm1091_vm2, %v1081_v34, 0.0 }
 0x174   : > { %v999_v50 = vpop.f32.mrf.mxu3 }
 0x175   : > { %v1000_v51 = vadd.f32 %v1791_v41, %v999_v50  ;;  %v1067_v53 = vmul.f32 %v1797_v47, %v1030_v49 }
 0x177   : > { %v1045_v54 = vmax.f32 %v1000_v51, 0.0  ;;  %v1116_v55 = vsel %vm1091_vm2, %v1067_v53, 0.0  ;;  %v1878_v53 = vld [vmem:[#allocation3] ss:$0 sm:$0xff] }
 0x178   : > { %1159 = vadd.xlane.f32.xlu1 %v1158_v52  ;;  %v964_v56 = vpop.f32.mrf.mxu1  ;;  %1117 = vadd.xlane.f32.xlu2 %v1116_v55 }
 0x179   : > { %v965_v57 = vadd.f32 %v1791_v41, %v964_v56  ;;  %v1082_v59 = vmul.f32 %v1797_v47, %v1045_v54 }
 0x17b   : > { %v1031_v58 = vmax.f32 %v965_v57, 0.0  ;;  %v1161_v1 = vsel %vm1091_vm2, %v1082_v59, 0.0 }
 0x17c   : > { %v1002_v60 = vpop.f32.mrf.mxu3 }
 0x17d   : > { %v1003_v61 = vadd.f32 %v1791_v41, %v1002_v60  ;;  %v1068_v62 = vmul.f32 %v1797_v47, %v1031_v58 }
 0x17f   : > { %v1046_v63 = vmax.f32 %v1003_v61, 0.0  ;;  %v1119_v0 = vsel %vm1091_vm2, %v1068_v62, 0.0 }
 0x180   : > { %1120 = vadd.xlane.f32.xlu0 %v1119_v0  ;;  %1162 = vadd.xlane.f32.xlu2 %v1161_v1  ;;  %v967_v2 = vpop.f32.mrf.mxu1 }
 0x181   : > { %v968_v3 = vadd.f32 %v1791_v41, %v967_v2  ;;  %v1083_v4 = vmul.f32 %v1797_v47, %v1046_v63 }
 0x183   : > { %v1032_v5 = vmax.f32 %v968_v3, 0.0  ;;  %v1164_v8 = vsel %vm1091_vm2, %v1083_v4, 0.0 }
 0x184   : > { %v1004_v6 = vpop.f32.mrf.mxu3 }
 0x185   : > { %v1005_v7 = vadd.f32 %v1791_v41, %v1004_v6  ;;  %v1069_v9 = vmul.f32 %v1797_v47, %v1032_v5 }
 0x187   : > { %v1047_v10 = vmax.f32 %v1005_v7, 0.0  ;;  %v1122_v11 = vsel %vm1091_vm2, %v1069_v9, 0.0 }
 0x188   : > { %1165 = vadd.xlane.f32.xlu0 %v1164_v8  ;;  %v969_v12 = vpop.f32.mrf.mxu1  ;;  %1123 = vadd.xlane.f32.xlu1 %v1122_v11 }
 0x189   : > { %v970_v13 = vadd.f32 %v1791_v41, %v969_v12  ;;  %v1084_v15 = vmul.f32 %v1797_v47, %v1047_v10 }
 0x18b   : > { %v1033_v14 = vmax.f32 %v970_v13, 0.0  ;;  %v1167_v21 = vsel %vm1091_vm2, %v1084_v15, 0.0 }
 0x18c   : > { %v1007_v16 = vpop.f32.mrf.mxu3 }
 0x18d   : > { %v1008_v17 = vadd.f32 %v1791_v41, %v1007_v16  ;;  %v1070_v18 = vmul.f32 %v1797_v47, %v1033_v14 }
 0x18f   : > { %v1048_v19 = vmax.f32 %v1008_v17, 0.0  ;;  %v1125_v20 = vsel %vm1091_vm2, %v1070_v18, 0.0 }
 0x190   : > { %1126 = vadd.xlane.f32.xlu2 %v1125_v20  ;;  %1168 = vadd.xlane.f32.xlu1 %v1167_v21  ;;  %v972_v22 = vpop.f32.mrf.mxu1 }
 0x191   : > { %v973_v23 = vadd.f32 %v1791_v41, %v972_v22  ;;  %v1085_v24 = vmul.f32 %v1797_v47, %v1048_v19 }
 0x193   : > { %v1034_v25 = vmax.f32 %v973_v23, 0.0  ;;  %v1170_v28 = vsel %vm1091_vm2, %v1085_v24, 0.0 }
 0x194   : > { %v1009_v26 = vpop.f32.mrf.mxu3 }
 0x195   : > { %v1010_v27 = vadd.f32 %v1791_v41, %v1009_v26  ;;  %v1071_v29 = vmul.f32 %v1797_v47, %v1034_v25 }
 0x197   : > { %v1049_v30 = vmax.f32 %v1010_v27, 0.0  ;;  %v1128_v31 = vsel %vm1091_vm2, %v1071_v29, 0.0 }
 0x198   : > { %1171 = vadd.xlane.f32.xlu2 %v1170_v28  ;;  %v974_v32 = vpop.f32.mrf.mxu1  ;;  %1129 = vadd.xlane.f32.xlu0 %v1128_v31 }
 0x199   : > { %v975_v33 = vadd.f32 %v1791_v41, %v974_v32  ;;  %v1086_v36 = vmul.f32 %v1797_v47, %v1049_v30 }
 0x19b   : > { %v1035_v35 = vmax.f32 %v975_v33, 0.0  ;;  %v1173_v43 = vsel %vm1091_vm2, %v1086_v36, 0.0 }
 0x19c   : > { %v1012_v37 = vpop.f32.mrf.mxu3 }
 0x19d   : > { %v1013_v38 = vadd.f32 %v1791_v41, %v1012_v37  ;;  %v1072_v39 = vmul.f32 %v1797_v47, %v1035_v35 }
 0x19f   : > { %v1050_v40 = vmax.f32 %v1013_v38, 0.0  ;;  %v1131_v42 = vsel %vm1091_vm2, %v1072_v39, 0.0 }
 0x1a0   : > { %1132 = vadd.xlane.f32.xlu1 %v1131_v42  ;;  %1174 = vadd.xlane.f32.xlu0 %v1173_v43  ;;  %v977_v44 = vpop.f32.mrf.mxu1 }
 0x1a1   : > { %v978_v45 = vadd.f32 %v1791_v41, %v977_v44  ;;  %v1087_v46 = vmul.f32 %v1797_v47, %v1050_v40 }
 0x1a3   : > { %v1036_v48 = vmax.f32 %v978_v45, 0.0  ;;  %v1176_v49 = vsel %vm1091_vm2, %v1087_v46, 0.0 }
 0x1a4   : > { %v1014_v34 = vpop.f32.mrf.mxu3 }
 0x1a5   : > { %v1073_v50 = vmul.f32 %v1797_v47, %v1036_v48  ;;  %v1015_v13 = vadd.f32 %v1791_v41, %v1014_v34 }
 0x1a7   : > { %v1134_v51 = vsel %vm1091_vm2, %v1073_v50, 0.0  ;;  %v1051_v19 = vmax.f32 %v1015_v13, 0.0 }
 0x1a8   : > { %1177 = vadd.xlane.f32.xlu1 %v1176_v49  ;;  %v979_v52 = vpop.f32.mrf.mxu1  ;;  %1135 = vadd.xlane.f32.xlu2 %v1134_v51 }
 0x1a9   : > { %v980_v54 = vadd.f32 %v1791_v41, %v979_v52  ;;  %v1088_v22 = vmul.f32 %v1797_v47, %v1051_v19 }
 0x1ab   : > { %v1037_v55 = vmax.f32 %v980_v54, 0.0  ;;  %v1094_v56 = vpop.xlane.xlu0 %1093  ;;  %v1179_v24 = vsel %vm1091_vm2, %v1088_v22, 0.0 }
 0x1ac   : > { %v1191_v57 = vadd.f32 %v1878_v53, %v1094_v56  ;;  %v1017_v58 = vpop.f32.mrf.mxu3 }
 0x1ad   : > { %v1018_v59 = vadd.f32 %v1791_v41, %v1017_v58  ;;  %v1074_v60 = vmul.f32 %v1797_v47, %v1037_v55 }
 0x1ae   : > { %1224 = vst.msk [vmem:[%s1884_s12] sm:$0xff] %vm1223_vm3, %v1191_v57 }
 0x1af   : > { %v1052_v61 = vmax.f32 %v1018_v59, 0.0  ;;  %v1137_v62 = vsel %vm1091_vm2, %v1074_v60, 0.0 }
 0x1b0   : > { %v982_v63 = vpop.f32.mrf.mxu1  ;;  %1138 = vadd.xlane.f32.xlu0 %v1137_v62 }
 0x1b1   : > { %v983_v0 = vadd.f32 %v1791_v41, %v982_v63  ;;  %v1089_v1 = vmul.f32 %v1797_v47, %v1052_v61 }
 0x1b3   : > { %v1038_v2 = vmax.f32 %v983_v0, 0.0  ;;  %v1097_v3 = vpop.xlane.xlu0 %1096  ;;  %v1182_v8 = vsel %vm1091_vm2, %v1089_v1, 0.0 }
 0x1b4   : > { %v1192_v4 = vadd.f32 %v1878_v53, %v1097_v3  ;;  %v1019_v5 = vpop.f32.mrf.mxu3 }
 0x1b5   : > { %v1020_v6 = vadd.f32 %v1791_v41, %v1019_v5  ;;  %v1075_v7 = vmul.f32 %v1797_v47, %v1038_v2 }
 0x1b6   : > { %1225 = vst.msk [vmem:[%s1884_s12 + $0x8] sm:$0xff] %vm1223_vm3, %v1192_v4 }
 0x1b7   : > { %v1053_v9 = vmax.f32 %v1020_v6, 0.0  ;;  %v1140_v10 = vsel %vm1091_vm2, %v1075_v7, 0.0 }
 0x1b8   : > { %v984_v11 = vpop.f32.mrf.mxu1  ;;  %1141 = vadd.xlane.f32.xlu1 %v1140_v10  ;;  %1183 = vadd.xlane.f32.xlu0 %v1182_v8 }
 0x1b9   : > { %v985_v12 = vadd.f32 %v1791_v41, %v984_v11  ;;  %v1090_v16 = vmul.f32 %v1797_v47, %v1053_v9 }
 0x1bb   : > { %v1039_v14 = vmax.f32 %v985_v12, 0.0  ;;  %v1100_v15 = vpop.xlane.xlu1 %1099  ;;  %v1185_v20 = vsel %vm1091_vm2, %v1090_v16, 0.0 }
 0x1bc   : > { %v1193_v17 = vadd.f32 %v1878_v53, %v1100_v15 }
 0x1bd   : > { %v1076_v18 = vmul.f32 %v1797_v47, %v1039_v14 }
 0x1be   : > { %1226 = vst.msk [vmem:[%s1884_s12 + $0x10] sm:$0xff] %vm1223_vm3, %v1193_v17 }
 0x1bf   : > { %v1143_v21 = vsel %vm1091_vm2, %v1076_v18, 0.0 }
 0x1c0   : > { %1186 = vadd.xlane.f32.xlu1 %v1185_v20  ;;  %1144 = vadd.xlane.f32.xlu2 %v1143_v21 }
 0x1c3   : > { %v1103_v41 = vpop.xlane.xlu1 %1102 }
 0x1c4   : > { %v1194_v23 = vadd.f32 %v1878_v53, %v1103_v41 }
 0x1c6   : > { %1227 = vst.msk [vmem:[%s1884_s12 + $0x18] sm:$0xff] %vm1223_vm3, %v1194_v23 }
 0x1c7   : > { %v1148_v25 = vpop.xlane.xlu0 %1147 }
 0x1c8   : > { %1180 = vadd.xlane.f32.xlu2 %v1179_v24  ;;  %v1209_v26 = vadd.f32 %v1878_v53, %v1148_v25 }
 0x1ca   : > { %1242 = vst.msk [vmem:[%s1884_s12 + $0x90] sm:$0xff] %vm1223_vm3, %v1209_v26 }
 0x1cb   : > { %v1106_v27 = vpop.xlane.xlu2 %1105 }
 0x1cc   : > { %v1195_v28 = vadd.f32 %v1878_v53, %v1106_v27 }
 0x1ce   : > { %1228 = vst.msk [vmem:[%s1884_s12 + $0x20] sm:$0xff] %vm1223_vm3, %v1195_v28 }
 0x1cf   : > { %v1151_v47 = vpop.xlane.xlu1 %1150 }
 0x1d0   : > { %v1210_v29 = vadd.f32 %v1878_v53, %v1151_v47 }
 0x1d2   : > { %1243 = vst.msk [vmem:[%s1884_s12 + $0x98] sm:$0xff] %vm1223_vm3, %v1210_v29 }
 0x1d3   : > { %v1109_v30 = vpop.xlane.xlu2 %1108 }
 0x1d4   : > { %v1196_v31 = vadd.f32 %v1878_v53, %v1109_v30 }
 0x1d6   : > { %1229 = vst.msk [vmem:[%s1884_s12 + $0x28] sm:$0xff] %vm1223_vm3, %v1196_v31 }
 0x1db   : > { %v1154_v32 = vpop.xlane.xlu2 %1153  ;;  %v1112_v33 = vpop.xlane.xlu0 %1111 }
 0x1dc   : > { %v1211_v35 = vadd.f32 %v1878_v53, %v1154_v32  ;;  %v1197_v36 = vadd.f32 %v1878_v53, %v1112_v33 }
 0x1de   : > { %1244 = vst.msk [vmem:[%s1884_s12 + $0xa0] sm:$0xff] %vm1223_vm3, %v1211_v35 }
 0x1df   : > { %1230 = vst.msk [vmem:[%s1884_s12 + $0x30] sm:$0xff] %vm1223_vm3, %v1197_v36 }
 0x1e3   : > { %v1115_v37 = vpop.xlane.xlu1 %1114  ;;  %v1157_v38 = vpop.xlane.xlu0 %1156 }
 0x1e4   : > { %v1198_v39 = vadd.f32 %v1878_v53, %v1115_v37  ;;  %v1212_v40 = vadd.f32 %v1878_v53, %v1157_v38 }
 0x1e6   : > { %1231 = vst.msk [vmem:[%s1884_s12 + $0x38] sm:$0xff] %vm1223_vm3, %v1198_v39 }
 0x1e7   : > { %1245 = vst.msk [vmem:[%s1884_s12 + $0xa8] sm:$0xff] %vm1223_vm3, %v1212_v40 }
 0x1eb   : > { %v1160_v42 = vpop.xlane.xlu1 %1159  ;;  %v1118_v43 = vpop.xlane.xlu2 %1117 }
 0x1ec   : > { %v1213_v44 = vadd.f32 %v1878_v53, %v1160_v42  ;;  %v1199_v45 = vadd.f32 %v1878_v53, %v1118_v43 }
 0x1ee   : > { %1246 = vst.msk [vmem:[%s1884_s12 + $0xb0] sm:$0xff] %vm1223_vm3, %v1213_v44 }
 0x1ef   : > { %1232 = vst.msk [vmem:[%s1884_s12 + $0x40] sm:$0xff] %vm1223_vm3, %v1199_v45 }
 0x1f3   : > { %v1121_v46 = vpop.xlane.xlu0 %1120  ;;  %v1163_v48 = vpop.xlane.xlu2 %1162 }
 0x1f4   : > { %v1200_v34 = vadd.f32 %v1878_v53, %v1121_v46  ;;  %v1214_v49 = vadd.f32 %v1878_v53, %v1163_v48 }
 0x1f6   : > { %1233 = vst.msk [vmem:[%s1884_s12 + $0x48] sm:$0xff] %vm1223_vm3, %v1200_v34 }
 0x1f7   : > { %1247 = vst.msk [vmem:[%s1884_s12 + $0xb8] sm:$0xff] %vm1223_vm3, %v1214_v49 }
 0x1fb   : > { %v1166_v50 = vpop.xlane.xlu0 %1165  ;;  %v1124_v51 = vpop.xlane.xlu1 %1123 }
 0x1fc   : > { %v1215_v52 = vadd.f32 %v1878_v53, %v1166_v50  ;;  %v1201_v54 = vadd.f32 %v1878_v53, %v1124_v51 }
 0x1fe   : > { %1248 = vst.msk [vmem:[%s1884_s12 + $0xc0] sm:$0xff] %vm1223_vm3, %v1215_v52 }
 0x1ff   : > { %1234 = vst.msk [vmem:[%s1884_s12 + $0x50] sm:$0xff] %vm1223_vm3, %v1201_v54 }
 0x203   : > { %v1127_v55 = vpop.xlane.xlu2 %1126  ;;  %v1169_v56 = vpop.xlane.xlu1 %1168 }
 0x204   : > { %v1202_v57 = vadd.f32 %v1878_v53, %v1127_v55  ;;  %v1216_v58 = vadd.f32 %v1878_v53, %v1169_v56 }
 0x206   : > { %1235 = vst.msk [vmem:[%s1884_s12 + $0x58] sm:$0xff] %vm1223_vm3, %v1202_v57 }
 0x207   : > { %1249 = vst.msk [vmem:[%s1884_s12 + $0xc8] sm:$0xff] %vm1223_vm3, %v1216_v58 }
 0x20b   : > { %v1172_v59 = vpop.xlane.xlu2 %1171  ;;  %v1130_v60 = vpop.xlane.xlu0 %1129 }
 0x20c   : > { %v1217_v61 = vadd.f32 %v1878_v53, %v1172_v59  ;;  %v1203_v62 = vadd.f32 %v1878_v53, %v1130_v60 }
 0x20e   : > { %1250 = vst.msk [vmem:[%s1884_s12 + $0xd0] sm:$0xff] %vm1223_vm3, %v1217_v61 }
 0x20f   : > { %1236 = vst.msk [vmem:[%s1884_s12 + $0x60] sm:$0xff] %vm1223_vm3, %v1203_v62 }
 0x213   : > { %v1133_v63 = vpop.xlane.xlu1 %1132  ;;  %v1175_v0 = vpop.xlane.xlu0 %1174 }
 0x214   : > { %v1204_v1 = vadd.f32 %v1878_v53, %v1133_v63  ;;  %v1218_v2 = vadd.f32 %v1878_v53, %v1175_v0 }
 0x216   : > { %1237 = vst.msk [vmem:[%s1884_s12 + $0x68] sm:$0xff] %vm1223_vm3, %v1204_v1 }
 0x217   : > { %1251 = vst.msk [vmem:[%s1884_s12 + $0xd8] sm:$0xff] %vm1223_vm3, %v1218_v2 }
 0x21b   : > { %v1178_v3 = vpop.xlane.xlu1 %1177  ;;  %v1136_v4 = vpop.xlane.xlu2 %1135 }
 0x21c   : > { %v1219_v5 = vadd.f32 %v1878_v53, %v1178_v3  ;;  %v1205_v6 = vadd.f32 %v1878_v53, %v1136_v4 }
 0x21e   : > { %1252 = vst.msk [vmem:[%s1884_s12 + $0xe0] sm:$0xff] %vm1223_vm3, %v1219_v5 }
 0x21f   : > { %1238 = vst.msk [vmem:[%s1884_s12 + $0x70] sm:$0xff] %vm1223_vm3, %v1205_v6 }
 0x223   : > { %v1139_v7 = vpop.xlane.xlu0 %1138 }
 0x224   : > { %v1206_v8 = vadd.f32 %v1878_v53, %v1139_v7 }
 0x226   : > { %1239 = vst.msk [vmem:[%s1884_s12 + $0x78] sm:$0xff] %vm1223_vm3, %v1206_v8 }
 0x22b   : > { %v1142_v9 = vpop.xlane.xlu1 %1141  ;;  %v1184_v10 = vpop.xlane.xlu0 %1183 }
 0x22c   : > { %v1207_v11 = vadd.f32 %v1878_v53, %v1142_v9  ;;  %v1221_v12 = vadd.f32 %v1878_v53, %v1184_v10 }
 0x22e   : > { %1240 = vst.msk [vmem:[%s1884_s12 + $0x80] sm:$0xff] %vm1223_vm3, %v1207_v11 }
 0x22f   : > { %1254 = vst.msk [vmem:[%s1884_s12 + $0xf0] sm:$0xff] %vm1223_vm3, %v1221_v12 }
 0x233   : > { %v1187_v13 = vpop.xlane.xlu1 %1186  ;;  %v1145_v14 = vpop.xlane.xlu2 %1144 }
 0x234   : > { %v1222_v15 = vadd.f32 %v1878_v53, %v1187_v13  ;;  %v1208_v16 = vadd.f32 %v1878_v53, %v1145_v14 }
 0x236   : > { %1255 = vst.msk [vmem:[%s1884_s12 + $0xf8] sm:$0xff] %vm1223_vm3, %v1222_v15 }
 0x237   : > { %1241 = vst.msk [vmem:[%s1884_s12 + $0x88] sm:$0xff] %vm1223_vm3, %v1208_v16 }
 0x23b   : > { %v1181_v17 = vpop.xlane.xlu2 %1180 }
 0x23c   : > { %v1220_v18 = vadd.f32 %v1878_v53, %v1181_v17 }
 0x23e   : > { %1253 = vst.msk [vmem:[%s1884_s12 + $0xe8] sm:$0xff] %vm1223_vm3, %v1220_v18 }
 0x23f PF: > { %s19_s28 = sadd.s32 1, %s1550_s28   ;;  %s2016_s26 = smov %s1546_s27 }
 0x240   : > { %p16_p5 = scmp.ge.s32.totalorder %s19_s28, 4   ;;  %s2017_s27 = smov %s2019_s6 }
 0x242   :  { %18 = sbr.rel (!%p16_p5) target bundleno = 3 (0x3), region = 89 }

</bundles_post_ra>
